<compile_context>
chip_gen: v7x
topology: tpu7x:2x2x1
jax: 0.10.0
libtpu: 0.0.40
codegen_flags: <defaults>
</compile_context>

<pallas_src>
import functools

import jax
import jax.numpy as jnp
from jax.experimental import pallas as pl
from jax.experimental.pallas import tpu as pltpu

BN_EPS = 1e-5
LANE = 128
SUBLANE = 8
_MIB = 1 << 20


def _round_up(n, m):
    return (n + m - 1) // m * m


# -----------------------------------------------------------------------------
# Fast path: entire problem resident in VMEM, one grid step, no padding at all.
# -----------------------------------------------------------------------------
def _small_kernel(x_ref, w1_ref, g1_ref, beta1_ref, w2_ref, g2_ref, beta2_ref,
                  w3_ref, b3_ref, o_ref):
    x = x_ref[...]
    inv_n = jnp.float32(1.0 / x.shape[0])

    def bn_relu(h, g_ref, beta_ref):
        mu = jnp.sum(h, axis=0, keepdims=True) * inv_n
        d = h - mu
        var = jnp.sum(d * d, axis=0, keepdims=True) * inv_n   # two-pass variance
        scale = jax.lax.rsqrt(var + BN_EPS) * g_ref[...]
        return jnp.maximum(d * scale + beta_ref[...], 0.0)

    h1 = jnp.dot(x, w1_ref[...], preferred_element_type=jnp.float32)
    a1 = bn_relu(h1, g1_ref, beta1_ref)
    h2 = jnp.dot(a1, w2_ref[...], preferred_element_type=jnp.float32)
    a2 = bn_relu(h2, g2_ref, beta2_ref)
    o_ref[...] = (jnp.dot(a2, w3_ref[...], preferred_element_type=jnp.float32)
                  + b3_ref[...])


def _forward_small(x, params):
    B, d0 = x.shape
    d1 = params["w1"].shape[1]
    d2 = params["w2"].shape[1]
    d3 = params["w3"].shape[1]
    f32 = lambda a: a.astype(jnp.float32)
    args = (x, f32(params["w1"]), f32(params["g1"]), f32(params["beta1"]),
            f32(params["w2"]), f32(params["g2"]), f32(params["beta2"]),
            f32(params["w3"]), f32(params["b3"]))

    need = 4 * (2 * sum(a.size for a in args) + 2 * B * d3 + 4 * B * max(d1, d2))
    vmem_limit = int(min(64 * _MIB, max(2 * need, 32 * _MIB)))

    in_specs = [pl.BlockSpec(a.shape, lambda i: (0, 0)) for a in args]
    out = pl.pallas_call(
        _small_kernel,
        out_shape=jax.ShapeDtypeStruct((B, d3), jnp.float32),
        grid_spec=pltpu.PrefetchScalarGridSpec(
            num_scalar_prefetch=0,
            grid=(1,),
            in_specs=in_specs,
            out_specs=pl.BlockSpec((B, d3), lambda i: (0, 0)),
        ),
        compiler_params=pltpu.CompilerParams(
            dimension_semantics=("arbitrary",),
            vmem_limit_bytes=vmem_limit),
    )(*args)
    return out


# -----------------------------------------------------------------------------
# Batch-tiled 3-phase path for large problems.
#   phase 0: h1 = x@W1, accumulate BN1 sum/sumsq (optionally cache h1)
#   phase 1: h1 (cached or recomputed) -> BN1+ReLU -> h2 = a1@W2, BN2 stats
#   phase 2: h2 (cached or recomputed) -> BN2+ReLU -> out = a2@W3 + b3
# -----------------------------------------------------------------------------
def _accum_and_finalize(h, i, n_tiles, inv_n, valid, s_ref, q_ref,
                        gamma_ref, beta_ref):
    """Accumulate per-feature sum / sum-of-squares of h; on the last batch tile
    convert the scratch in place into the folded BN affine: q <- scale, s <- shift."""
    @pl.when(i == 0)
    def _init():
        s_ref[...] = jnp.zeros_like(s_ref)
        q_ref[...] = jnp.zeros_like(q_ref)

    hm = h if valid is None else h * valid
    s_ref[...] += jnp.sum(hm, axis=0, keepdims=True)
    q_ref[...] += jnp.sum(hm * h, axis=0, keepdims=True)

    @pl.when(i == n_tiles - 1)
    def _finalize():
        mu = s_ref[...] * inv_n
        # TODO(synk): single-pass variance (E[h^2]-E[h]^2) in f32 loses precision
        # when |mean| >> std; the original f64 module does not. Clamped to >= 0.
        var = jnp.maximum(q_ref[...] * inv_n - mu * mu, 0.0)
        scale = jax.lax.rsqrt(var + BN_EPS) * gamma_ref[...]
        q_ref[...] = scale                       # folded BN scale
        s_ref[...] = beta_ref[...] - mu * scale  # folded BN shift


def _tiled_kernel(x_ref,
                  w1_ref, g1_ref, beta1_ref,
                  w2_ref, g2_ref, beta2_ref,
                  w3_ref, b3_ref,
                  o_ref,
                  s1_ref, q1_ref, s2_ref, q2_ref, *cache_refs,
                  tile_b, n_valid, need_mask, cache_h):
    k = pl.program_id(0)          # phase: 0 = BN1 stats, 1 = BN2 stats, 2 = output
    i = pl.program_id(1)          # batch tile index
    n_tiles = pl.num_programs(1)
    inv_n = jnp.float32(1.0 / n_valid)

    def valid_mask():
        if not need_mask:
            return None
        row = jax.lax.broadcasted_iota(jnp.int32, (tile_b, 1), 0) + i * tile_b
        return (row < n_valid).astype(jnp.float32)

    def matmul1():
        # b1 dropped: training-mode BN mean subtraction cancels it exactly.
        return jnp.dot(x_ref[...], w1_ref[...], preferred_element_type=jnp.float32)

    def bn_relu(h, q_ref, s_ref):
        return jnp.maximum(h * q_ref[...] + s_ref[...], 0.0)

    if cache_h:
        h1c_ref, h2c_ref = cache_refs
        row0 = pl.multiple_of(i * tile_b, SUBLANE)

        @pl.when(k == 0)
        def _phase0():
            h1 = matmul1()
            h1c_ref[pl.ds(row0, tile_b), :] = h1
            _accum_and_finalize(h1, i, n_tiles, inv_n, valid_mask(),
                                s1_ref, q1_ref, g1_ref, beta1_ref)

        @pl.when(k == 1)
        def _phase1():
            h1 = h1c_ref[pl.ds(row0, tile_b), :]
            a1 = bn_relu(h1, q1_ref, s1_ref)
            h2 = jnp.dot(a1, w2_ref[...], preferred_element_type=jnp.float32)
            h2c_ref[pl.ds(row0, tile_b), :] = h2
            _accum_and_finalize(h2, i, n_tiles, inv_n, valid_mask(),
                                s2_ref, q2_ref, g2_ref, beta2_ref)

        @pl.when(k == 2)
        def _phase2():
            h2 = h2c_ref[pl.ds(row0, tile_b), :]
            a2 = bn_relu(h2, q2_ref, s2_ref)
            o_ref[...] = (jnp.dot(a2, w3_ref[...], preferred_element_type=jnp.float32)
                          + b3_ref[...])
    else:
        # Recompute schedule (large-model fallback when the h1/h2 cache does not fit).
        h1 = matmul1()

        @pl.when(k == 0)
        def _phase0():
            _accum_and_finalize(h1, i, n_tiles, inv_n, valid_mask(),
                                s1_ref, q1_ref, g1_ref, beta1_ref)

        @pl.when(k >= 1)
        def _later():
            a1 = bn_relu(h1, q1_ref, s1_ref)
            h2 = jnp.dot(a1, w2_ref[...], preferred_element_type=jnp.float32)

            @pl.when(k == 1)
            def _phase1():
                _accum_and_finalize(h2, i, n_tiles, inv_n, valid_mask(),
                                    s2_ref, q2_ref, g2_ref, beta2_ref)

            @pl.when(k == 2)
            def _phase2():
                a2 = bn_relu(h2, q2_ref, s2_ref)
                o_ref[...] = (jnp.dot(a2, w3_ref[...],
                                      preferred_element_type=jnp.float32)
                              + b3_ref[...])


def _forward_tiled(x, params, tile_b, cache_intermediates):
    B, d0 = x.shape
    d1 = params["w1"].shape[1]
    d2 = params["w2"].shape[1]
    d3 = params["w3"].shape[1]
    d1p, d2p, d3p = (_round_up(d, LANE) for d in (d1, d2, d3))

    # --- tile / VMEM budgeting (conservative: safe on v5e/v6e/v7x) ------------
    budget = 24 * _MIB
    weight_bytes = 4 * 2 * (d0 * d1p + d1p * d2p + d2p * d3p
                            + 2 * (d1p + d2p) + d3p)          # double-buffered
    row_bytes = 4 * (2 * (d0 + d3p) + 4 * max(d1p, d2p))      # x/out tiles + temps
    stat_bytes = 4 * 2 * (d1p + d2p)

    if tile_b is None:
        tile_b = 512
        while tile_b > SUBLANE and (weight_bytes + stat_bytes
                                    + tile_b * row_bytes) > budget:
            tile_b //= 2
    tile_b = max(SUBLANE, _round_up(min(tile_b, _round_up(B, SUBLANE)), SUBLANE))
    bp = _round_up(B, tile_b)
    n_tiles = bp // tile_b
    need_mask = (bp != B)

    base_need = weight_bytes + stat_bytes + tile_b * row_bytes
    cache_bytes = 4 * bp * (d1p + d2p)
    if cache_intermediates is None:
        cache_h = (base_need + cache_bytes) <= budget
    else:
        cache_h = bool(cache_intermediates)
    need = base_need + (cache_bytes if cache_h else 0)
    vmem_limit = int(min(64 * _MIB, max(2 * need, 32 * _MIB)))

    # --- operand preparation (feature axes lane-padded, x only row-padded) ----
    # TODO(synk): in production hoist this parameter padding out of the per-call path.
    def pad2(a, r, c, fill=0.0):
        a = a.astype(jnp.float32)
        if a.shape == (r, c):
            return a
        buf = jnp.full((r, c), fill, jnp.float32)
        return buf.at[:a.shape[0], :a.shape[1]].set(a)

    xp = pad2(x, bp, d0)                       # keep natural feature width d0
    w1p = pad2(params["w1"], d0, d1p)
    w2p = pad2(params["w2"], d1p, d2p)
    w3p = pad2(params["w3"], d2p, d3p)
    g1p = pad2(params["g1"], 1, d1p, fill=1.0)
    beta1p = pad2(params["beta1"], 1, d1p)
    g2p = pad2(params["g2"], 1, d2p, fill=1.0)
    beta2p = pad2(params["beta2"], 1, d2p)
    b3p = pad2(params["b3"], 1, d3p)
    # b1 / b2 intentionally NOT passed to the kernel (cancelled by BN).

    const = lambda k, i: (0, 0)
    if cache_h:
        x_map = lambda k, i: (jnp.where(k == 0, i, 0), 0)   # x DMA only in phase 0
    else:
        x_map = lambda k, i: (i, 0)
    out_map = lambda k, i: (jnp.where(k == 2, i, 0), 0)     # writeback only in phase 2

    in_specs = [
        pl.BlockSpec((tile_b, d0), x_map),      # x tiles (pipelined)
        pl.BlockSpec((d0, d1p), const),         # W1 (VMEM-resident)
        pl.BlockSpec((1, d1p), const),          # gamma1
        pl.BlockSpec((1, d1p), const),          # beta1
        pl.BlockSpec((d1p, d2p), const),        # W2
        pl.BlockSpec((1, d2p), const),          # gamma2
        pl.BlockSpec((1, d2p), const),          # beta2
        pl.BlockSpec((d2p, d3p), const),        # W3
        pl.BlockSpec((1, d3p), const),          # b3
    ]

    scratch = [
        pltpu.VMEM((1, d1p), jnp.float32),      # BN1 sum  -> shift
        pltpu.VMEM((1, d1p), jnp.float32),      # BN1 sumsq -> scale
        pltpu.VMEM((1, d2p), jnp.float32),      # BN2 sum  -> shift
        pltpu.VMEM((1, d2p), jnp.float32),      # BN2 sumsq -> scale
    ]
    if cache_h:
        scratch += [pltpu.VMEM((bp, d1p), jnp.float32),     # h1 cache
                    pltpu.VMEM((bp, d2p), jnp.float32)]     # h2 cache

    grid_spec = pltpu.PrefetchScalarGridSpec(
        num_scalar_prefetch=0,
        grid=(3, n_tiles),
        in_specs=in_specs,
        out_specs=pl.BlockSpec((tile_b, d3p), out_map),
        scratch_shapes=scratch,
    )

    if cache_h:
        flops = 2 * bp * (d0 * d1p + d1p * d2p + d2p * d3p)
        x_reads = 1
    else:
        flops = 2 * bp * (3 * d0 * d1p + 2 * d1p * d2p + d2p * d3p)
        x_reads = 3
    bytes_accessed = 4 * (x_reads * bp * d0 + d0 * d1p + d1p * d2p + d2p * d3p
                          + 2 * (d1p + d2p) + d3p + bp * d3p)
    cost = pl.CostEstimate(flops=flops, transcendentals=d1p + d2p,
                           bytes_accessed=bytes_accessed)

    kernel = functools.partial(_tiled_kernel, tile_b=tile_b, n_valid=B,
                               need_mask=need_mask, cache_h=cache_h)
    out = pl.pallas_call(
        kernel,
        out_shape=jax.ShapeDtypeStruct((bp, d3p), jnp.float32),
        grid_spec=grid_spec,
        compiler_params=pltpu.CompilerParams(
            dimension_semantics=("arbitrary", "arbitrary"),
            vmem_limit_bytes=vmem_limit),
        cost_estimate=cost,
    )(xp, w1p, g1p, beta1p, w2p, g2p, beta2p, w3p, b3p)
    return out[:B, :d3]


def nn_qdn_forward(x, params, *, tile_b=None, force_tiled=False,
                   cache_intermediates=None):
    """params: w1,w2,w3 as (in,out); b1,b2 ignored (BN-cancelled); b3,g*,beta* as (1,out)."""
    x = x.astype(jnp.float32)
    B, d0 = x.shape
    d1 = params["w1"].shape[1]
    d2 = params["w2"].shape[1]
    d3 = params["w3"].shape[1]

    fast_need = 4 * (2 * (B * d0 + d0 * d1 + d1 * d2 + d2 * d3
                          + 2 * (d1 + d2) + d3 + B * d3)
                     + 4 * B * max(d1, d2))
    if not force_tiled and fast_need <= 12 * _MIB:
        return _forward_small(x, params)
    return _forward_tiled(x, params, tile_b, cache_intermediates)


# -----------------------------------------------------------------------------
# Parameter init (PyTorch nn.Linear defaults) and pure-JAX reference.
# -----------------------------------------------------------------------------
def init_params(key, input_dim, output_dim, list_weights):
    dims = [input_dim] + list(list_weights) + [output_dim]
    params = {}
    names = ["1", "2", "3"]
    for i, name in enumerate(names):
        fan_in, fan_out = dims[i], dims[i + 1]
        key, kw, kb = jax.random.split(key, 3)
        bound = 1.0 / jnp.sqrt(jnp.float32(fan_in))
        params[f"w{name}"] = jax.random.uniform(
            kw, (fan_in, fan_out), jnp.float32, -bound, bound)
        params[f"b{name}"] = jax.random.uniform(
            kb, (1, fan_out), jnp.float32, -bound, bound)
        if i < len(names) - 1:  # BatchNorm only on hidden layers
            params[f"g{name}"] = jnp.ones((1, fan_out), jnp.float32)
            params[f"beta{name}"] = jnp.zeros((1, fan_out), jnp.float32)
    return params


def reference_forward(x, params):
    """Pure-JAX reference of the PyTorch module forward (with hidden biases)."""
    def bn_relu(h, g, b):
        mu = jnp.mean(h, axis=0, keepdims=True)
        var = jnp.mean((h - mu) ** 2, axis=0, keepdims=True)
        return jnp.maximum((h - mu) / jnp.sqrt(var + BN_EPS) * g + b, 0.0)
    h = bn_relu(x @ params["w1"] + params["b1"], params["g1"], params["beta1"])
    h = bn_relu(h @ params["w2"] + params["b2"], params["g2"], params["beta2"])
    return h @ params["w3"] + params["b3"]


if __name__ == "__main__":
    # NN_QDN(input_dim=16, output_dim=4, activation_function=nn.ReLU(), list_weights=[32, 32])
    batch, input_dim, output_dim = 20, 16, 4
    list_weights = [32, 32]

    key = jax.random.PRNGKey(0)
    key, kx = jax.random.split(key)
    x = jax.random.normal(kx, (batch, input_dim), jnp.float32)
    params = init_params(key, input_dim, output_dim, list_weights)

    ref = reference_forward(x, params)

    # 1) Single-block fast path (fires automatically at this size).
    out_fast = jax.block_until_ready(nn_qdn_forward(x, params))
    assert out_fast.shape == (batch, output_dim)
    assert jnp.allclose(out_fast, ref, atol=3e-4, rtol=3e-4), "fast path mismatch"

    # 2) Batch-tiled 3-phase path with cached h1/h2 (ragged last tile exercised).
    out_cached = jax.block_until_ready(
        nn_qdn_forward(x, params, force_tiled=True, tile_b=8,
                       cache_intermediates=True))
    assert jnp.allclose(out_cached, ref, atol=3e-4, rtol=3e-4), "cached path mismatch"

    # 3) Batch-tiled recompute fallback (large-model configuration).
    out_recomp = jax.block_until_ready(
        nn_qdn_forward(x, params, force_tiled=True, tile_b=8,
                       cache_intermediates=False))
    assert jnp.allclose(out_recomp, ref, atol=3e-4, rtol=3e-4), "recompute path mismatch"

    print("KERNEL_OK")
</pallas_src>

<mosaic_0001>
module attributes {stable_mosaic.version = 11 : i64} {
  func.func @_small_kernel(%arg0: i32, %arg1: memref<20x16xf32, #tpu.memory_space<vmem>>, %arg2: memref<16x32xf32, #tpu.memory_space<vmem>>, %arg3: memref<1x32xf32, #tpu.memory_space<vmem>>, %arg4: memref<1x32xf32, #tpu.memory_space<vmem>>, %arg5: memref<32x32xf32, #tpu.memory_space<vmem>>, %arg6: memref<1x32xf32, #tpu.memory_space<vmem>>, %arg7: memref<1x32xf32, #tpu.memory_space<vmem>>, %arg8: memref<32x4xf32, #tpu.memory_space<vmem>>, %arg9: memref<1x4xf32, #tpu.memory_space<vmem>>, %arg10: memref<20x4xf32, #tpu.memory_space<vmem>>) attributes {dimension_semantics = [#tpu.dimension_semantics<arbitrary>], iteration_bounds = array<i64: 1>, scalar_prefetch = 0 : i64, scratch_operands = 0 : i64, tpu.core_type = #tpu.core_type<tc>, window_params = [{pipeline_mode = #tpu.pipeline_mode<synchronous>, transform_indices = @transform_0, window_bounds = array<i64: 20, 16>}, {pipeline_mode = #tpu.pipeline_mode<synchronous>, transform_indices = @transform_1, window_bounds = array<i64: 16, 32>}, {pipeline_mode = #tpu.pipeline_mode<synchronous>, transform_indices = @transform_2, window_bounds = array<i64: 1, 32>}, {pipeline_mode = #tpu.pipeline_mode<synchronous>, transform_indices = @transform_3, window_bounds = array<i64: 1, 32>}, {pipeline_mode = #tpu.pipeline_mode<synchronous>, transform_indices = @transform_4, window_bounds = array<i64: 32, 32>}, {pipeline_mode = #tpu.pipeline_mode<synchronous>, transform_indices = @transform_5, window_bounds = array<i64: 1, 32>}, {pipeline_mode = #tpu.pipeline_mode<synchronous>, transform_indices = @transform_6, window_bounds = array<i64: 1, 32>}, {pipeline_mode = #tpu.pipeline_mode<synchronous>, transform_indices = @transform_7, window_bounds = array<i64: 32, 4>}, {pipeline_mode = #tpu.pipeline_mode<synchronous>, transform_indices = @transform_8, window_bounds = array<i64: 1, 4>}, {pipeline_mode = #tpu.pipeline_mode<synchronous>, transform_indices = @transform_9, window_bounds = array<i64: 20, 4>}]} {
    %c0 = arith.constant 0 : index
    %c0_0 = arith.constant 0 : index
    %0 = vector.load %arg1[%c0, %c0_0] : memref<20x16xf32, #tpu.memory_space<vmem>>, vector<20x16xf32>
    %c0_1 = arith.constant 0 : index
    %c0_2 = arith.constant 0 : index
    %1 = vector.load %arg2[%c0_1, %c0_2] : memref<16x32xf32, #tpu.memory_space<vmem>>, vector<16x32xf32>
    %cst = arith.constant dense<0.000000e+00> : vector<20x32xf32>
    %2 = tpu.matmul %0, %1, %cst {dimension_numbers = #tpu.dot_dimension_numbers<[1], [0], [0], [1], [0, 0, 1, 1], [], []>} : vector<20x16xf32>, vector<16x32xf32>, vector<20x32xf32> -> vector<20x32xf32>
    %cst_3 = arith.constant dense<0.000000e+00> : vector<32xf32>
    %3 = vector.multi_reduction <add>, %2, %cst_3 [0] : vector<20x32xf32> to vector<32xf32>
    %4 = vector.shape_cast %3 : vector<32xf32> to vector<1x32xf32>
    %cst_4 = arith.constant 5.000000e-02 : f32
    %5 = vector.broadcast %cst_4 : f32 to vector<1x32xf32>
    %6 = arith.mulf %4, %5 : vector<1x32xf32>
    %7 = vector.broadcast %6 : vector<1x32xf32> to vector<20x32xf32>
    %8 = arith.subf %2, %7 : vector<20x32xf32>
    %9 = arith.mulf %8, %8 : vector<20x32xf32>
    %cst_5 = arith.constant dense<0.000000e+00> : vector<32xf32>
    %10 = vector.multi_reduction <add>, %9, %cst_5 [0] : vector<20x32xf32> to vector<32xf32>
    %11 = vector.shape_cast %10 : vector<32xf32> to vector<1x32xf32>
    %cst_6 = arith.constant 5.000000e-02 : f32
    %12 = vector.broadcast %cst_6 : f32 to vector<1x32xf32>
    %13 = arith.mulf %11, %12 : vector<1x32xf32>
    %cst_7 = arith.constant 9.99999974E-6 : f32
    %14 = vector.broadcast %cst_7 : f32 to vector<1x32xf32>
    %15 = arith.addf %13, %14 : vector<1x32xf32>
    %16 = math.rsqrt %15 : vector<1x32xf32>
    %c0_8 = arith.constant 0 : index
    %c0_9 = arith.constant 0 : index
    %17 = vector.load %arg3[%c0_8, %c0_9] : memref<1x32xf32, #tpu.memory_space<vmem>>, vector<1x32xf32>
    %18 = arith.mulf %16, %17 : vector<1x32xf32>
    %19 = vector.broadcast %18 : vector<1x32xf32> to vector<20x32xf32>
    %20 = arith.mulf %8, %19 : vector<20x32xf32>
    %c0_10 = arith.constant 0 : index
    %c0_11 = arith.constant 0 : index
    %21 = vector.load %arg4[%c0_10, %c0_11] : memref<1x32xf32, #tpu.memory_space<vmem>>, vector<1x32xf32>
    %22 = vector.broadcast %21 : vector<1x32xf32> to vector<20x32xf32>
    %23 = arith.addf %20, %22 : vector<20x32xf32>
    %cst_12 = arith.constant 0.000000e+00 : f32
    %24 = vector.broadcast %cst_12 : f32 to vector<20x32xf32>
    %25 = arith.maximumf %23, %24 : vector<20x32xf32>
    %c0_13 = arith.constant 0 : index
    %c0_14 = arith.constant 0 : index
    %26 = vector.load %arg5[%c0_13, %c0_14] : memref<32x32xf32, #tpu.memory_space<vmem>>, vector<32x32xf32>
    %cst_15 = arith.constant dense<0.000000e+00> : vector<20x32xf32>
    %27 = tpu.matmul %25, %26, %cst_15 {dimension_numbers = #tpu.dot_dimension_numbers<[1], [0], [0], [1], [0, 0, 1, 1], [], []>} : vector<20x32xf32>, vector<32x32xf32>, vector<20x32xf32> -> vector<20x32xf32>
    %cst_16 = arith.constant dense<0.000000e+00> : vector<32xf32>
    %28 = vector.multi_reduction <add>, %27, %cst_16 [0] : vector<20x32xf32> to vector<32xf32>
    %29 = vector.shape_cast %28 : vector<32xf32> to vector<1x32xf32>
    %cst_17 = arith.constant 5.000000e-02 : f32
    %30 = vector.broadcast %cst_17 : f32 to vector<1x32xf32>
    %31 = arith.mulf %29, %30 : vector<1x32xf32>
    %32 = vector.broadcast %31 : vector<1x32xf32> to vector<20x32xf32>
    %33 = arith.subf %27, %32 : vector<20x32xf32>
    %34 = arith.mulf %33, %33 : vector<20x32xf32>
    %cst_18 = arith.constant dense<0.000000e+00> : vector<32xf32>
    %35 = vector.multi_reduction <add>, %34, %cst_18 [0] : vector<20x32xf32> to vector<32xf32>
    %36 = vector.shape_cast %35 : vector<32xf32> to vector<1x32xf32>
    %cst_19 = arith.constant 5.000000e-02 : f32
    %37 = vector.broadcast %cst_19 : f32 to vector<1x32xf32>
    %38 = arith.mulf %36, %37 : vector<1x32xf32>
    %cst_20 = arith.constant 9.99999974E-6 : f32
    %39 = vector.broadcast %cst_20 : f32 to vector<1x32xf32>
    %40 = arith.addf %38, %39 : vector<1x32xf32>
    %41 = math.rsqrt %40 : vector<1x32xf32>
    %c0_21 = arith.constant 0 : index
    %c0_22 = arith.constant 0 : index
    %42 = vector.load %arg6[%c0_21, %c0_22] : memref<1x32xf32, #tpu.memory_space<vmem>>, vector<1x32xf32>
    %43 = arith.mulf %41, %42 : vector<1x32xf32>
    %44 = vector.broadcast %43 : vector<1x32xf32> to vector<20x32xf32>
    %45 = arith.mulf %33, %44 : vector<20x32xf32>
    %c0_23 = arith.constant 0 : index
    %c0_24 = arith.constant 0 : index
    %46 = vector.load %arg7[%c0_23, %c0_24] : memref<1x32xf32, #tpu.memory_space<vmem>>, vector<1x32xf32>
    %47 = vector.broadcast %46 : vector<1x32xf32> to vector<20x32xf32>
    %48 = arith.addf %45, %47 : vector<20x32xf32>
    %cst_25 = arith.constant 0.000000e+00 : f32
    %49 = vector.broadcast %cst_25 : f32 to vector<20x32xf32>
    %50 = arith.maximumf %48, %49 : vector<20x32xf32>
    %c0_26 = arith.constant 0 : index
    %c0_27 = arith.constant 0 : index
    %51 = vector.load %arg8[%c0_26, %c0_27] : memref<32x4xf32, #tpu.memory_space<vmem>>, vector<32x4xf32>
    %cst_28 = arith.constant dense<0.000000e+00> : vector<20x4xf32>
    %52 = tpu.matmul %50, %51, %cst_28 {dimension_numbers = #tpu.dot_dimension_numbers<[1], [0], [0], [1], [0, 0, 1, 1], [], []>} : vector<20x32xf32>, vector<32x4xf32>, vector<20x4xf32> -> vector<20x4xf32>
    %c0_29 = arith.constant 0 : index
    %c0_30 = arith.constant 0 : index
    %53 = vector.load %arg9[%c0_29, %c0_30] : memref<1x4xf32, #tpu.memory_space<vmem>>, vector<1x4xf32>
    %54 = vector.broadcast %53 : vector<1x4xf32> to vector<20x4xf32>
    %55 = arith.addf %52, %54 : vector<20x4xf32>
    %c0_31 = arith.constant 0 : index
    %c0_32 = arith.constant 0 : index
    %56 = vector.load %arg10[%c0_31, %c0_32] : memref<20x4xf32, #tpu.memory_space<vmem>>, vector<20x4xf32>
    tpu.vector_store %arg10[%c0_31, %c0_32], %55 {strides = array<i32>} : memref<20x4xf32, #tpu.memory_space<vmem>>, vector<20x4xf32>,
    return
  }
  func.func @transform_0(%arg0: i32) -> (i32, i32) {
    %c0_i32 = arith.constant 0 : i32
    %c0_i32_0 = arith.constant 0 : i32
    %c0_i32_1 = arith.constant 0 : i32
    return %c0_i32, %c0_i32_0 : i32, i32
  }
  func.func @transform_1(%arg0: i32) -> (i32, i32) {
    %c0_i32 = arith.constant 0 : i32
    %c0_i32_0 = arith.constant 0 : i32
    %c0_i32_1 = arith.constant 0 : i32
    return %c0_i32, %c0_i32_0 : i32, i32
  }
  func.func @transform_2(%arg0: i32) -> (i32, i32) {
    %c0_i32 = arith.constant 0 : i32
    %c0_i32_0 = arith.constant 0 : i32
    %c0_i32_1 = arith.constant 0 : i32
    return %c0_i32, %c0_i32_0 : i32, i32
  }
  func.func @transform_3(%arg0: i32) -> (i32, i32) {
    %c0_i32 = arith.constant 0 : i32
    %c0_i32_0 = arith.constant 0 : i32
    %c0_i32_1 = arith.constant 0 : i32
    return %c0_i32, %c0_i32_0 : i32, i32
  }
  func.func @transform_4(%arg0: i32) -> (i32, i32) {
    %c0_i32 = arith.constant 0 : i32
    %c0_i32_0 = arith.constant 0 : i32
    %c0_i32_1 = arith.constant 0 : i32
    return %c0_i32, %c0_i32_0 : i32, i32
  }
  func.func @transform_5(%arg0: i32) -> (i32, i32) {
    %c0_i32 = arith.constant 0 : i32
    %c0_i32_0 = arith.constant 0 : i32
    %c0_i32_1 = arith.constant 0 : i32
    return %c0_i32, %c0_i32_0 : i32, i32
  }
  func.func @transform_6(%arg0: i32) -> (i32, i32) {
    %c0_i32 = arith.constant 0 : i32
    %c0_i32_0 = arith.constant 0 : i32
    %c0_i32_1 = arith.constant 0 : i32
    return %c0_i32, %c0_i32_0 : i32, i32
  }
  func.func @transform_7(%arg0: i32) -> (i32, i32) {
    %c0_i32 = arith.constant 0 : i32
    %c0_i32_0 = arith.constant 0 : i32
    %c0_i32_1 = arith.constant 0 : i32
    return %c0_i32, %c0_i32_0 : i32, i32
  }
  func.func @transform_8(%arg0: i32) -> (i32, i32) {
    %c0_i32 = arith.constant 0 : i32
    %c0_i32_0 = arith.constant 0 : i32
    %c0_i32_1 = arith.constant 0 : i32
    return %c0_i32, %c0_i32_0 : i32, i32
  }
  func.func @transform_9(%arg0: i32) -> (i32, i32) {
    %c0_i32 = arith.constant 0 : i32
    %c0_i32_0 = arith.constant 0 : i32
    %c0_i32_1 = arith.constant 0 : i32
    return %c0_i32, %c0_i32_0 : i32, i32
  }
}

</mosaic_0001>

<bundles_post_ra>
// kernel: tpu_custom_call.1
= control target key start
LH: loop header
LB: loop body
LE: loop exit
PB: predicated region body
PF: predicated region fallthrough
CT: control target
= control target key end

     0   :  { %v541_v0 = vmov 0.0|0.0   ;;  %vm542_vm0 = vmmov 0   ;;  %v543_v3 = vmov 0.0   ;;  %vm37_vm1 = vcmask 130048   ;;  %s706_s1 = inlined_call_operand.vmem [shape: f32[16,32], index: 1, kind: input, shape index: {}]   ;;  %s707_s0 = inlined_call_operand.vmem [shape: f32[20,16], index: 0, kind: input, shape index: {}]   ;;  %s708_s4 = inlined_call_operand.vmem [shape: f32[32,32], index: 4, kind: input, shape index: {}]   ;;  %s709_s2 = inlined_call_operand.vmem [shape: f32[1,32], index: 2, kind: input, shape index: {}]   ;;  %s710_s3 = inlined_call_operand.vmem [shape: f32[1,32], index: 3, kind: input, shape index: {}]   ;;  %s711_s7 = inlined_call_operand.vmem [shape: f32[32,4], index: 7, kind: input, shape index: {}]   ;;  %s712_s5 = inlined_call_operand.vmem [shape: f32[1,32], index: 5, kind: input, shape index: {}]   ;;  %s713_s6 = inlined_call_operand.vmem [shape: f32[1,32], index: 6, kind: input, shape index: {}]   ;;  %s714_s8 = inlined_call_operand.vmem [shape: f32[1,4], index: 8, kind: input, shape index: {}]   ;;  %s715_s9 = inlined_call_operand.vmem [shape: f32[20,4], index: 9, kind: output, shape index: {}]  }
   0x1   :  { %517 = vmatprep.subr.bf16.mxu0 %v541_v0  ;;  %v35_v1 = vld [vmem:[%s706_s1] sm:$0xff]  ;;  %v36_v2 = vld [vmem:[%s706_s1 + $0x8] sm:$0xff]  ;;  %474 = vmatprep.mubr.msk.f32.mxu0 %vm542_vm0, %v543_v3  ;;  %v34_v6 = vld [vmem:[%s707_s0 + $0x10] sm:$0xf]  ;;  %vm127_vm2 = vcmask 261120   ;;  %vm131_vm3 = vcmask 257024   ;;  %v163_v51 = vlaneseq }
   0x2   :  { %v518_v4 = vpack.c.bf16 %v36_v2, %v35_v1  ;;  %532 = vmatprep.subr.bf16.mxu1 %v541_v0  ;;  %480 = vmatprep.mubr.msk.f32.mxu1 %vm542_vm0, %v543_v3  ;;  %v32_v5 = vld [vmem:[%s707_s0] sm:$0xff]  ;;  %v33_v7 = vld [vmem:[%s707_s0 + $0x8] sm:$0xff]  ;;  %v185_v11 = vld [vmem:[%s708_s4 + $0x10] sm:$0xff]  ;;  %vm430_vm4 = vcmask 31744   ;;  %vm433_vm5 = vcmask 27648  }
   0x3   :  { %v183_v8 = vld [vmem:[%s708_s4] sm:$0xff]  ;;  %v184_v9 = vld [vmem:[%s708_s4 + $0x8] sm:$0xff]  ;;  %v186_v12 = vld [vmem:[%s708_s4 + $0x18] sm:$0xff]  ;;  %v642_v52 = vshrl.u32 %v163_v51, 7 }
   0x4   :  { %519 = vmatpush3.bf16.msra.mxu0 %v518_v4  ;;  %533 = vmatpush3.bf16.msra.mxu1 %v518_v4  ;;  %v521_v10 = vpack.c.bf16 %v184_v9, %v183_v8  ;;  %v524_v13 = vpack.c.bf16 %v186_v12, %v185_v11  ;;  %v161_v53 = vld [vmem:[%s709_s2] sm:$0x1]  ;;  %v332_v9 = vld [vmem:[%s711_s7 + $0x10] sm:$0xff] }
   0x5   :  { %520 = vmatprep.subr.bf16.mxu1 %v541_v0  ;;  %526 = vmatprep.subr.bf16.mxu0 %v541_v0  ;;  %v165_v54 = vsub.s32 0, %v642_v52  ;;  %v442_v58 = vld [vmem:[%s710_s3] ss:$0 sm:$0xff] }
   0x7   :  { %475 = vmatmul.mubr.msk.f32.vlgmr.msra.gmra.mrb[0].mxu0 %vm37_vm1, %v32_v5  ;;  %481 = vmatmul.mubr.msk.f32.vlgmr.msra.gmra.mrb[0].mxu1 %vm37_vm1, %v34_v6  ;;  %v330_v6 = vld [vmem:[%s711_s7] sm:$0xff] }
   0x8   :  { %477 = vmatprep.mubr.msk.f32.mxu0 %vm542_vm0, %v543_v3  ;;  %491 = vmatprep.mubr.msk.f32.mxu1 %vm542_vm0, %v543_v3 }
   0x9   :  { %522 = vmatpush3.bf16.msra.mxu1 %v521_v10  ;;  %v333_v10 = vld [vmem:[%s711_s7 + $0x18] sm:$0xff] }
   0xa   :  { %523 = vmatprep.subr.bf16.mxu1 %v541_v0  ;;  %v530_v11 = vpack.c.bf16 %v333_v10, %v332_v9 }
   0xb   :  { %478 = vmatmul.mubr.msk.f32.gmra.mrb[2].mxu0 %vm37_vm1, %v33_v7  ;;  %v331_v7 = vld [vmem:[%s711_s7 + $0x8] sm:$0xff] }
   0xc   :  { %508 = vmatprep.mubr.msk.f32.mxu0 %vm542_vm0, %v543_v3  ;;  %v527_v8 = vpack.c.bf16 %v331_v7, %v330_v6 }
   0xd   :  { %525 = vmatpush3.bf16.msra.mxu1 %v524_v13 }
   0xe   :  { %528 = vmatpush3.bf16.msra.mxu0 %v527_v8 }
   0xf   :  { %529 = vmatprep.subr.bf16.mxu0 %v541_v0 }
  0x12   :  { %531 = vmatpush3.bf16.msra.mxu0 %v530_v11 }
  0xda   :  { %v113_v14 = vpop.f32.mrb[0].mxu0  ;;  %v123_v15 = vpop.f32.mrb[0].mxu1 }
  0xdb   :  { %v476_v16 = vpop.f32.mrb[1].mxu0  ;;  %v482_v17 = vpop.f32.mrb[1].mxu1  ;;  %v128_v19 = vsel %vm127_vm2, %v113_v14, 0.0  ;;  %v132_v22 = vsel %vm131_vm3, %v123_v15, 0.0 }
  0xde   :  { %v118_v18 = vpop.f32.mrb[2].mxu0 }
  0xdf   :  { %v129_v20 = vsel %vm127_vm2, %v118_v18, 0.0  ;;  %v479_v21 = vpop.f32.mrb[3].mxu0 }
  0xe0   :  { %v130_v23 = vadd.f32 %v129_v20, %v128_v19 }
  0xe2   :  { %v133_v24 = vadd.f32 %v132_v22, %v130_v23 }
  0xe4   :  { %v134_v25 = vrot.slane %v133_v24, 4 }
  0xe6   :  { %v135_v26 = vadd.f32 %v134_v25, %v133_v24 }
  0xe8   :  { %v136_v27 = vrot.slane %v135_v26, 2 }
  0xea   :  { %v137_v28 = vadd.f32 %v136_v27, %v135_v26 }
  0xec   :  { %v138_v29 = vrot.slane %v137_v28, 1 }
  0xee   :  { %v139_v30 = vadd.f32 %v138_v29, %v137_v28 }
  0xf0   :  { %v140_v31 = vmul.f32 0.05, %v139_v30 }
  0xf2   :  { %v141_v32 = vsub.f32 %v113_v14, %v140_v31  ;;  %v142_v33 = vsub.f32 %v118_v18, %v140_v31  ;;  %v143_v34 = vsub.f32 %v123_v15, %v140_v31 }
  0xf4   :  { %v144_v35 = vmul.f32 %v141_v32, %v141_v32  ;;  %v145_v36 = vmul.f32 %v142_v33, %v142_v33  ;;  %v146_v37 = vmul.f32 %v143_v34, %v143_v34 }
  0xf6   :  { %v147_v38 = vsel %vm127_vm2, %v144_v35, 0.0  ;;  %v148_v39 = vsel %vm127_vm2, %v145_v36, 0.0  ;;  %v150_v41 = vsel %vm131_vm3, %v146_v37, 0.0 }
  0xf7   :  { %v149_v40 = vadd.f32 %v148_v39, %v147_v38 }
  0xf9   :  { %v151_v42 = vadd.f32 %v150_v41, %v149_v40 }
  0xfb   :  { %v152_v43 = vrot.slane %v151_v42, 4 }
  0xfd   :  { %v153_v44 = vadd.f32 %v152_v43, %v151_v42 }
  0xff   :  { %v154_v45 = vrot.slane %v153_v44, 2 }
 0x101   :  { %v155_v46 = vadd.f32 %v154_v45, %v153_v44 }
 0x103   :  { %v156_v47 = vrot.slane %v155_v46, 1 }
 0x105   :  { %v157_v48 = vadd.f32 %v156_v47, %v155_v46 }
 0x107   :  { %v158_v49 = vmul.f32 0.05, %v157_v48  ;;  %v308_v48 = vld [vmem:[%s712_s5] sm:$0x1] }
 0x109   :  { %v159_v50 = vadd.f32 1e-05, %v158_v49 }
 0x10b   :  { %537 = vrsqrt.f32 %v159_v50 }
 0x115   :  { %v538_v55 = vpop.eup %537 }
 0x116   :  { %v162_v56 = vmul.f32 %v538_v55, %v161_v53  ;;  %v446_v53 = vld [vmem:[%s713_s6] ss:$0 sm:$0xff] }
 0x118   :  { %v166_v57 = vrot.slane %v162_v56, %v165_v54 }
 0x11a   :  { %v167_v59 = vmul.f32 %v166_v57, %v141_v32  ;;  %v169_v60 = vmul.f32 %v166_v57, %v143_v34  ;;  %v168_v61 = vmul.f32 %v166_v57, %v142_v33 }
 0x11c   :  { %v177_v62 = vadd.f32 %v442_v58, %v167_v59  ;;  %v178_v1 = vadd.f32 %v442_v58, %v168_v61  ;;  %v179_v2 = vadd.f32 %v442_v58, %v169_v60 }
 0x11e   :  { %v180_v63 = vmax.f32 %v177_v62, 0.0  ;;  %v181_v4 = vmax.f32 %v178_v1, 0.0  ;;  %v182_v5 = vmax.f32 %v179_v2, 0.0 }
 0x120   :  { %492 = vmatmul.mubr.msk.f32.vlgmr.msra.gmra.mrb[2].mxu1 %vm127_vm2, %v180_v63 }
 0x121   :  { %494 = vmatprep.mubr.msk.f32.mxu1 %vm542_vm0, %v543_v3 }
 0x124   :  { %495 = vmatmul.mubr.msk.f32.gmra.mrb[4].mxu1 %vm127_vm2, %v181_v4 }
 0x125   :  { %497 = vmatprep.mubr.msk.f32.mxu1 %vm542_vm0, %v543_v3 }
 0x128   :  { %498 = vmatmul.mubr.msk.f32.gmra.mrb[6].mxu1 %vm127_vm2, %v182_v5 }
 0x1f3   :  { %v262_v12 = vpop.f32.mrb[2].mxu1 }
 0x1f4   :  { %v493_v13 = vpop.f32.mrb[3].mxu1  ;;  %v276_v15 = vsel %vm127_vm2, %v262_v12, 0.0 }
 0x1f7   :  { %v267_v14 = vpop.f32.mrb[4].mxu1 }
 0x1f8   :  { %v277_v16 = vsel %vm127_vm2, %v267_v14, 0.0  ;;  %v496_v17 = vpop.f32.mrb[5].mxu1 }
 0x1f9   :  { %v278_v18 = vadd.f32 %v277_v16, %v276_v15 }
 0x1fb   :  { %v272_v0 = vpop.f32.mrb[6].mxu1 }
 0x1fc   :  { %v279_v19 = vsel %vm131_vm3, %v272_v0, 0.0  ;;  %v499_v20 = vpop.f32.mrb[7].mxu1 }
 0x1fd   :  { %v280_v21 = vadd.f32 %v279_v19, %v278_v18 }
 0x1ff   :  { %v281_v22 = vrot.slane %v280_v21, 4 }
 0x201   :  { %v282_v23 = vadd.f32 %v281_v22, %v280_v21 }
 0x203   :  { %v283_v24 = vrot.slane %v282_v23, 2 }
 0x205   :  { %v284_v25 = vadd.f32 %v283_v24, %v282_v23 }
 0x207   :  { %v285_v26 = vrot.slane %v284_v25, 1 }
 0x209   :  { %v286_v27 = vadd.f32 %v285_v26, %v284_v25 }
 0x20b   :  { %v287_v28 = vmul.f32 0.05, %v286_v27 }
 0x20d   :  { %v288_v29 = vsub.f32 %v262_v12, %v287_v28  ;;  %v289_v30 = vsub.f32 %v267_v14, %v287_v28  ;;  %v290_v31 = vsub.f32 %v272_v0, %v287_v28 }
 0x20f   :  { %v291_v32 = vmul.f32 %v288_v29, %v288_v29  ;;  %v292_v33 = vmul.f32 %v289_v30, %v289_v30  ;;  %v293_v34 = vmul.f32 %v290_v31, %v290_v31 }
 0x211   :  { %v294_v35 = vsel %vm127_vm2, %v291_v32, 0.0  ;;  %v295_v36 = vsel %vm127_vm2, %v292_v33, 0.0  ;;  %v297_v38 = vsel %vm131_vm3, %v293_v34, 0.0 }
 0x212   :  { %v296_v37 = vadd.f32 %v295_v36, %v294_v35 }
 0x214   :  { %v298_v39 = vadd.f32 %v297_v38, %v296_v37 }
 0x216   :  { %v299_v40 = vrot.slane %v298_v39, 4 }
 0x218   :  { %v300_v41 = vadd.f32 %v299_v40, %v298_v39 }
 0x21a   :  { %v301_v42 = vrot.slane %v300_v41, 2 }
 0x21c   :  { %v302_v43 = vadd.f32 %v301_v42, %v300_v41 }
 0x21e   :  { %v303_v44 = vrot.slane %v302_v43, 1 }
 0x220   :  { %v304_v45 = vadd.f32 %v303_v44, %v302_v43 }
 0x222   :  { %v305_v46 = vmul.f32 0.05, %v304_v45 }
 0x224   :  { %v306_v47 = vadd.f32 1e-05, %v305_v46 }
 0x226   :  { %539 = vrsqrt.f32 %v306_v47 }
 0x230   :  { %v540_v49 = vpop.eup %539 }
 0x231   :  { %v309_v50 = vmul.f32 %v540_v49, %v308_v48 }
 0x233   :  { %v313_v51 = vrot.slane %v309_v50, %v165_v54  ;;  %v447_v54 = vld [vmem:[%s714_s8] ss:$0 sm:$0xff] }
 0x235   :  { %v314_v55 = vmul.f32 %v313_v51, %v288_v29  ;;  %v316_v56 = vmul.f32 %v313_v51, %v290_v31  ;;  %v315_v57 = vmul.f32 %v313_v51, %v289_v30 }
 0x237   :  { %v324_v58 = vadd.f32 %v446_v53, %v314_v55  ;;  %v325_v60 = vadd.f32 %v446_v53, %v315_v57  ;;  %v326_v61 = vadd.f32 %v446_v53, %v316_v56 }
 0x239   :  { %v327_v59 = vmax.f32 %v324_v58, 0.0  ;;  %v328_v62 = vmax.f32 %v325_v60, 0.0  ;;  %v329_v52 = vmax.f32 %v326_v61, 0.0 }
 0x23b   :  { %509 = vmatmul.mubr.msk.f32.vlgmr.msra.gmra.mrb[4].mxu0 %vm127_vm2, %v327_v59 }
 0x23c   :  { %511 = vmatprep.mubr.msk.f32.mxu0 %vm542_vm0, %v543_v3 }
 0x23f   :  { %512 = vmatmul.mubr.msk.f32.gmra.mrb[6].mxu0 %vm127_vm2, %v328_v62 }
 0x240   :  { %514 = vmatprep.mubr.msk.f32.mxu0 %vm542_vm0, %v543_v3 }
 0x243   :  { %515 = vmatmul.mubr.msk.f32.gmra.mrb[8].mxu0 %vm127_vm2, %v329_v52 }
 0x30e   :  { %v416_v63 = vpop.f32.mrb[4].mxu0 }
 0x30f   :  { %v417_v1 = vadd.f32 %v447_v54, %v416_v63  ;;  %v510_v2 = vpop.f32.mrb[5].mxu0 }
 0x311   :  { %431 = vst.msk [vmem:[%s715_s9] sm:$0xff] %vm430_vm4, %v417_v1 }
 0x312   :  { %v421_v4 = vpop.f32.mrb[6].mxu0 }
 0x313   :  { %v422_v5 = vadd.f32 %v447_v54, %v421_v4  ;;  %v513_v6 = vpop.f32.mrb[7].mxu0 }
 0x315   :  { %432 = vst.msk [vmem:[%s715_s9 + $0x8] sm:$0xff] %vm430_vm4, %v422_v5 }
 0x316   :  { %v426_v3 = vpop.f32.mrb[8].mxu0 }
 0x317   :  { %v427_v7 = vadd.f32 %v447_v54, %v426_v3  ;;  %v516_v8 = vpop.f32.mrb[9].mxu0 }
 0x319   :  { %434 = vst.msk [vmem:[%s715_s9 + $0x10] sm:$0xf] %vm433_vm5, %v427_v7 }

</bundles_post_ra>
